<compile_context>
chip_gen: v7x
topology: tpu7x:2x2x1
jax: 0.10.0
libtpu: 0.0.40
codegen_flags: <defaults>
</compile_context>

<pallas_src>
import functools
import math

import jax
import jax.numpy as jnp
from jax import lax
from jax.experimental import pallas as pl
from jax.experimental.pallas import tpu as pltpu


def _round_up(x, m):
    return (x + m - 1) // m * m


def _conv_part_kernel(pc_ref, pr_ref, wc_ref, wr_ref, b_ref, thr_ref, o_ref,
                      *, thresh_slope):
    """One M-tile: compare matmul reused as a partial sum of the full matmul,
    then the threshold gate and the elementwise product.  Few live (tm, OCp)
    temporaries are kept simultaneously alive."""
    cmp = jnp.dot(pc_ref[...], wc_ref[...],
                  preferred_element_type=jnp.float32) + b_ref[...]
    # thr_ref already holds (thresh + 0.5/thresh_slope), folded on the host.
    # (The PyTorch compare.detach() is a forward no-op.)
    gate = jnp.maximum(
        1.0 - jnp.maximum(thr_ref[...] - cmp, 0.0) * thresh_slope, 0.0)
    full = cmp + jnp.dot(pr_ref[...], wr_ref[...],
                         preferred_element_type=jnp.float32)
    o_ref[...] = (full * gate).astype(o_ref.dtype)


def _im2col(x, KH, KW, stride, padding, dilation, OH, OW):
    """x: [B, Csub, H, W] -> [B*OH*OW, Csub*KH*KW], K order = (c, kh, kw)."""
    B, C, _, _ = x.shape
    sh, sw = stride
    ph, pw = padding
    dh, dw = dilation
    xp = jnp.pad(x, ((0, 0), (0, 0), (ph, ph), (pw, pw)))
    cols = []
    for kh in range(KH):
        for kw in range(KW):
            cols.append(
                xp[:, :,
                   kh * dh: kh * dh + (OH - 1) * sh + 1: sh,
                   kw * dw: kw * dw + (OW - 1) * sw + 1: sw])
    p = jnp.stack(cols, axis=0).reshape(KH, KW, B, C, OH, OW)
    p = p.transpose(2, 4, 5, 3, 0, 1)               # [B, OH, OW, C, KH, KW]
    return p.reshape(B * OH * OW, C * KH * KW)


def _vmem_budget_bytes():
    """One VMEM budget used by both the tile picker and vmem_limit_bytes:
    ~40 MiB on v7x (64 MiB/TC), ~80 MiB on v5e/v6e (128 MiB)."""
    try:
        cap = int(pltpu.get_tpu_info().vmem_capacity_bytes)
    except Exception:
        cap = 64 * 1024 * 1024          # v7x per-TensorCore VMEM (smallest)
    return min(cap * 5 // 8, 96 * 1024 * 1024)


def _pick_tile_m(M, K_total, ocp, op_itemsize, out_itemsize, budget_bytes):
    """Row-tile size: budget the double-buffered resident operands, the
    double-buffered patch/output tiles and the live f32 temporaries, then cap
    so the grid has >= ~8 steps (>= 4 per TensorCore on v7x) for overlap."""
    align = 16 if op_itemsize < 4 else 8            # bf16 packs 16 sublanes/vreg
    # Constant-index operands (weights, bias, thresh) are fetched once but the
    # default pipelining still reserves 2 VMEM buffers each.
    resident = 2 * (K_total * ocp * op_itemsize + 2 * ocp * 4)
    headroom = 4 * 1024 * 1024                      # compiler scratch, sems
    avail = budget_bytes - resident - headroom
    if avail <= 0:
        # TODO(synk): add a K-reduction grid axis instead of failing here.
        raise ValueError("Conv2d_part weights too large to keep resident in "
                         "VMEM for this TPU generation.")
    per_row = (2 * K_total * op_itemsize            # double-buffered patch row
               + 2 * ocp * out_itemsize             # double-buffered out row
               + 3 * ocp * 4)                       # live f32 temporaries
    tm = avail // per_row
    # Keep enough grid steps that the pipeline overlaps DMA with MXU work.
    tm = min(tm, 1024, _round_up(pl.cdiv(M, 8), align))
    tm = max(align, tm // align * align)
    if tm >= 256:
        tm = tm // 128 * 128                        # whole-MXU-pass row tiles
    if M <= tm:
        tm = _round_up(max(M, 1), align)
    return tm


def conv2d_part_forward(x, weight, bias, thresh, *,
                        stride=(1, 1), padding=(0, 0), dilation=(1, 1),
                        comp_channels=2, thresh_slope=0.5,
                        compute_dtype=jnp.bfloat16, out_layout="NCHW"):
    """x: [B, C, H, W] (NCHW). weight: [OC, C, KH, KW]. bias: [OC].
    thresh: [OC, 1, 1]. Returns [B, OC, OH, OW] (or NHWC if requested).
    compute_dtype: bf16 operands / f32 accumulation by default (all TPU gens);
    pass jnp.float32 (or None) for bit-tight numerics."""
    B, C, H, W = x.shape
    OC, Cw, KH, KW = weight.shape
    assert Cw == C, "groups != 1 not supported"      # TODO(synk): grouped conv
    cc = C // comp_channels
    assert 0 < cc < C, "need 0 < C // comp_channels < C"
    # TODO(synk): comp_channels == 1 (compare conv == full conv) not specialized.

    sh, sw = stride
    ph, pw = padding
    dh, dw = dilation
    OH = (H + 2 * ph - dh * (KH - 1) - 1) // sh + 1
    OW = (W + 2 * pw - dw * (KW - 1) - 1) // sw + 1
    M = B * OH * OW
    Kc = cc * KH * KW
    Kr = (C - cc) * KH * KW

    # Host-side im2col, split at the compare boundary -> layout-aligned matmul
    # operands (no in-kernel lane-axis slicing).  See TODO(synk) at top of
    # file about fusing this into the kernel.
    patches_cmp = _im2col(x[:, :cc], KH, KW, stride, padding, dilation, OH, OW)
    patches_rest = _im2col(x[:, cc:], KH, KW, stride, padding, dilation, OH, OW)

    # Output lane width: keep OC unpadded when small (cuts the output HBM
    # write stream by up to 128/OC, worth more than the masked-store penalty
    # at mem-bound); pad to a lane-dense multiple of 128 when OC is large.
    # TODO(synk): prefer multiples of 256 when OC >= 256 for v6e/v7x MXU.
    OCp = OC if OC <= 128 else _round_up(OC, 128)
    pad_n = OCp - OC
    w_cmp = weight[:, :cc].reshape(OC, Kc).T
    w_rest = weight[:, cc:].reshape(OC, Kr).T
    b_row = bias.reshape(1, OC)
    thr_row = thresh.reshape(1, OC) + 0.5 / thresh_slope
    if pad_n:
        w_cmp = jnp.pad(w_cmp, ((0, 0), (0, pad_n)))
        w_rest = jnp.pad(w_rest, ((0, 0), (0, pad_n)))
        b_row = jnp.pad(b_row, ((0, 0), (0, pad_n)))
        thr_row = jnp.pad(thr_row, ((0, 0), (0, pad_n)))

    if compute_dtype is not None:
        patches_cmp = patches_cmp.astype(compute_dtype)
        patches_rest = patches_rest.astype(compute_dtype)
        w_cmp = w_cmp.astype(compute_dtype)
        w_rest = w_rest.astype(compute_dtype)

    op_itemsize = jnp.dtype(patches_cmp.dtype).itemsize
    out_itemsize = jnp.dtype(x.dtype).itemsize
    budget = _vmem_budget_bytes()
    tm = _pick_tile_m(M, Kc + Kr, OCp, op_itemsize, out_itemsize, budget)
    M_pad = _round_up(M, tm)
    if M_pad != M:
        patches_cmp = jnp.pad(patches_cmp, ((0, M_pad - M), (0, 0)))
        patches_rest = jnp.pad(patches_rest, ((0, M_pad - M), (0, 0)))

    kernel = functools.partial(_conv_part_kernel, thresh_slope=thresh_slope)
    flops = 2 * M_pad * (Kc + Kr) * OCp              # compare matmul reused
    bytes_accessed = int(op_itemsize * (M_pad * (Kc + Kr) + (Kc + Kr) * OCp)
                         + 4 * 2 * OCp + out_itemsize * M_pad * OCp)

    out = pl.pallas_call(
        kernel,
        out_shape=jax.ShapeDtypeStruct((M_pad, OCp), x.dtype),
        grid_spec=pltpu.PrefetchScalarGridSpec(
            num_scalar_prefetch=0,
            grid=(M_pad // tm,),
            in_specs=[
                pl.BlockSpec((tm, Kc), lambda i: (i, 0)),    # patches (cmp cols)
                pl.BlockSpec((tm, Kr), lambda i: (i, 0)),    # patches (rest cols)
                # Constant-index operands: fetched once, kept resident
                # (their 2x default buffering is accounted in _pick_tile_m).
                pl.BlockSpec((Kc, OCp), lambda i: (0, 0)),   # w_cmp
                pl.BlockSpec((Kr, OCp), lambda i: (0, 0)),   # w_rest
                pl.BlockSpec((1, OCp), lambda i: (0, 0)),    # bias row
                pl.BlockSpec((1, OCp), lambda i: (0, 0)),    # thresh_eff row
            ],
            out_specs=pl.BlockSpec((tm, OCp), lambda i: (i, 0)),
        ),
        compiler_params=pltpu.CompilerParams(
            dimension_semantics=("parallel",),       # v7x: 2 TCs split M tiles
            vmem_limit_bytes=budget,
        ),
        cost_estimate=pl.CostEstimate(flops=flops, transcendentals=0,
                                      bytes_accessed=bytes_accessed),
    )(patches_cmp, patches_rest, w_cmp, w_rest, b_row, thr_row)

    out = out[:M, :OC].reshape(B, OH, OW, OC)        # NHWC
    if out_layout == "NHWC":
        return out                                    # skip extra HBM transpose
    return out.transpose(0, 3, 1, 2)                  # NCHW (module parity)


def _ref_forward(x, weight, bias, thresh, stride, padding, dilation,
                 comp_channels, thresh_slope):
    """Pure-JAX reference (matches the PyTorch forward)."""
    dn = lax.conv_dimension_numbers(x.shape, weight.shape,
                                    ('NCHW', 'OIHW', 'NCHW'))
    pad = [(padding[0], padding[0]), (padding[1], padding[1])]
    conv = lambda xi, wi: lax.conv_general_dilated(
        xi, wi, stride, pad, rhs_dilation=dilation, dimension_numbers=dn)
    b4 = bias.reshape(1, -1, 1, 1)
    t4 = thresh.reshape(1, -1, 1, 1)
    cc = x.shape[1] // comp_channels
    cmp = conv(x[:, :cc], weight[:, :cc]) + b4
    temp = jnp.maximum(-cmp + (t4 + 0.5 / thresh_slope), 0.0) * thresh_slope
    gate = jnp.maximum(1.0 - temp, 0.0)
    full = conv(x, weight) + b4
    return full * gate


if __name__ == "__main__":
    # Module hyperparameters (small, consistent with the PyTorch module).
    B, C, H, W = 2, 4, 16, 16
    OC, KH, KW = 8, 3, 3
    stride, padding, dilation = (1, 1), (1, 1), (1, 1)
    comp_channels, thresh_slope, thresh_factor = 2, 0.5, -1.0

    key = jax.random.PRNGKey(0)
    kx, kw, kb = jax.random.split(key, 3)

    # Deterministic parameter init matching _ConvNd.reset_parameters:
    # uniform(-stdv, stdv) with stdv = 1/sqrt(in_channels * KH * KW).
    stdv = 1.0 / math.sqrt(C * KH * KW)
    weight = jax.random.uniform(kw, (OC, C, KH, KW), jnp.float32,
                                minval=-stdv, maxval=stdv)
    bias = jax.random.uniform(kb, (OC,), jnp.float32,
                              minval=-stdv, maxval=stdv)
    thresh = thresh_factor * jnp.ones((OC, 1, 1), jnp.float32)

    x = jax.random.normal(kx, (B, C, H, W), jnp.float32)

    ref = _ref_forward(x, weight, bias, thresh, stride, padding, dilation,
                       comp_channels, thresh_slope)

    # f32 operand path: tight numerics check against the reference.
    out_f32 = conv2d_part_forward(x, weight, bias, thresh,
                                  stride=stride, padding=padding,
                                  dilation=dilation,
                                  comp_channels=comp_channels,
                                  thresh_slope=thresh_slope,
                                  compute_dtype=jnp.float32)
    out_f32 = jax.block_until_ready(out_f32)
    assert out_f32.shape == (B, OC, H, W)
    assert jnp.allclose(out_f32, ref, atol=1e-4, rtol=1e-4), "f32 mismatch"

    # Default path: bf16 operands / f32 accumulation (recommended on all gens).
    out_bf16 = conv2d_part_forward(x, weight, bias, thresh,
                                   stride=stride, padding=padding,
                                   dilation=dilation,
                                   comp_channels=comp_channels,
                                   thresh_slope=thresh_slope)
    out_bf16 = jax.block_until_ready(out_bf16)
    assert out_bf16.shape == (B, OC, H, W)
    assert jnp.allclose(out_bf16, ref, atol=1e-1, rtol=1e-1), "bf16 mismatch"

    print("KERNEL_OK")
</pallas_src>

<mosaic_0001>
module attributes {stable_mosaic.version = 11 : i64} {
  func.func @_conv_part_kernel(%arg0: i32, %arg1: memref<64x18xf32, #tpu.memory_space<vmem>>, %arg2: memref<64x18xf32, #tpu.memory_space<vmem>>, %arg3: memref<18x8xf32, #tpu.memory_space<vmem>>, %arg4: memref<18x8xf32, #tpu.memory_space<vmem>>, %arg5: memref<1x8xf32, #tpu.memory_space<vmem>>, %arg6: memref<1x8xf32, #tpu.memory_space<vmem>>, %arg7: memref<64x8xf32, #tpu.memory_space<vmem>>) attributes {dimension_semantics = [#tpu.dimension_semantics<parallel>], iteration_bounds = array<i64: 8>, scalar_prefetch = 0 : i64, scratch_operands = 0 : i64, tpu.core_type = #tpu.core_type<tc>, window_params = [{transform_indices = @transform_0, window_bounds = array<i64: 64, 18>}, {transform_indices = @transform_1, window_bounds = array<i64: 64, 18>}, {pipeline_mode = #tpu.pipeline_mode<synchronous>, transform_indices = @transform_2, window_bounds = array<i64: 18, 8>}, {pipeline_mode = #tpu.pipeline_mode<synchronous>, transform_indices = @transform_3, window_bounds = array<i64: 18, 8>}, {pipeline_mode = #tpu.pipeline_mode<synchronous>, transform_indices = @transform_4, window_bounds = array<i64: 1, 8>}, {pipeline_mode = #tpu.pipeline_mode<synchronous>, transform_indices = @transform_5, window_bounds = array<i64: 1, 8>}, {transform_indices = @transform_6, window_bounds = array<i64: 64, 8>}]} {
    %c0 = arith.constant 0 : index
    %c0_0 = arith.constant 0 : index
    %0 = vector.load %arg1[%c0, %c0_0] : memref<64x18xf32, #tpu.memory_space<vmem>>, vector<64x18xf32>
    %c0_1 = arith.constant 0 : index
    %c0_2 = arith.constant 0 : index
    %1 = vector.load %arg3[%c0_1, %c0_2] : memref<18x8xf32, #tpu.memory_space<vmem>>, vector<18x8xf32>
    %cst = arith.constant dense<0.000000e+00> : vector<64x8xf32>
    %2 = tpu.matmul %0, %1, %cst {dimension_numbers = #tpu.dot_dimension_numbers<[1], [0], [0], [1], [0, 0, 1, 1], [], []>} : vector<64x18xf32>, vector<18x8xf32>, vector<64x8xf32> -> vector<64x8xf32>
    %c0_3 = arith.constant 0 : index
    %c0_4 = arith.constant 0 : index
    %3 = vector.load %arg5[%c0_3, %c0_4] : memref<1x8xf32, #tpu.memory_space<vmem>>, vector<1x8xf32>
    %4 = vector.broadcast %3 : vector<1x8xf32> to vector<64x8xf32>
    %5 = arith.addf %2, %4 : vector<64x8xf32>
    %c0_5 = arith.constant 0 : index
    %c0_6 = arith.constant 0 : index
    %6 = vector.load %arg6[%c0_5, %c0_6] : memref<1x8xf32, #tpu.memory_space<vmem>>, vector<1x8xf32>
    %7 = vector.broadcast %6 : vector<1x8xf32> to vector<64x8xf32>
    %8 = arith.subf %7, %5 : vector<64x8xf32>
    %cst_7 = arith.constant 0.000000e+00 : f32
    %9 = vector.broadcast %cst_7 : f32 to vector<64x8xf32>
    %10 = arith.maximumf %8, %9 : vector<64x8xf32>
    %cst_8 = arith.constant 5.000000e-01 : f32
    %11 = vector.broadcast %cst_8 : f32 to vector<64x8xf32>
    %12 = arith.mulf %10, %11 : vector<64x8xf32>
    %cst_9 = arith.constant 1.000000e+00 : f32
    %13 = vector.broadcast %cst_9 : f32 to vector<64x8xf32>
    %14 = arith.subf %13, %12 : vector<64x8xf32>
    %cst_10 = arith.constant 0.000000e+00 : f32
    %15 = vector.broadcast %cst_10 : f32 to vector<64x8xf32>
    %16 = arith.maximumf %14, %15 : vector<64x8xf32>
    %c0_11 = arith.constant 0 : index
    %c0_12 = arith.constant 0 : index
    %17 = vector.load %arg2[%c0_11, %c0_12] : memref<64x18xf32, #tpu.memory_space<vmem>>, vector<64x18xf32>
    %c0_13 = arith.constant 0 : index
    %c0_14 = arith.constant 0 : index
    %18 = vector.load %arg4[%c0_13, %c0_14] : memref<18x8xf32, #tpu.memory_space<vmem>>, vector<18x8xf32>
    %cst_15 = arith.constant dense<0.000000e+00> : vector<64x8xf32>
    %19 = tpu.matmul %17, %18, %cst_15 {dimension_numbers = #tpu.dot_dimension_numbers<[1], [0], [0], [1], [0, 0, 1, 1], [], []>} : vector<64x18xf32>, vector<18x8xf32>, vector<64x8xf32> -> vector<64x8xf32>
    %20 = arith.addf %5, %19 : vector<64x8xf32>
    %21 = arith.mulf %20, %16 : vector<64x8xf32>
    %c0_16 = arith.constant 0 : index
    %c0_17 = arith.constant 0 : index
    %22 = vector.load %arg7[%c0_16, %c0_17] : memref<64x8xf32, #tpu.memory_space<vmem>>, vector<64x8xf32>
    tpu.vector_store %arg7[%c0_16, %c0_17], %21 {strides = array<i32>} : memref<64x8xf32, #tpu.memory_space<vmem>>, vector<64x8xf32>,
    return
  }
  func.func @transform_0(%arg0: i32) -> (i32, i32) {
    %c0_i32 = arith.constant 0 : i32
    %c0_i32_0 = arith.constant 0 : i32
    return %arg0, %c0_i32 : i32, i32
  }
  func.func @transform_1(%arg0: i32) -> (i32, i32) {
    %c0_i32 = arith.constant 0 : i32
    %c0_i32_0 = arith.constant 0 : i32
    return %arg0, %c0_i32 : i32, i32
  }
  func.func @transform_2(%arg0: i32) -> (i32, i32) {
    %c0_i32 = arith.constant 0 : i32
    %c0_i32_0 = arith.constant 0 : i32
    %c0_i32_1 = arith.constant 0 : i32
    return %c0_i32, %c0_i32_0 : i32, i32
  }
  func.func @transform_3(%arg0: i32) -> (i32, i32) {
    %c0_i32 = arith.constant 0 : i32
    %c0_i32_0 = arith.constant 0 : i32
    %c0_i32_1 = arith.constant 0 : i32
    return %c0_i32, %c0_i32_0 : i32, i32
  }
  func.func @transform_4(%arg0: i32) -> (i32, i32) {
    %c0_i32 = arith.constant 0 : i32
    %c0_i32_0 = arith.constant 0 : i32
    %c0_i32_1 = arith.constant 0 : i32
    return %c0_i32, %c0_i32_0 : i32, i32
  }
  func.func @transform_5(%arg0: i32) -> (i32, i32) {
    %c0_i32 = arith.constant 0 : i32
    %c0_i32_0 = arith.constant 0 : i32
    %c0_i32_1 = arith.constant 0 : i32
    return %c0_i32, %c0_i32_0 : i32, i32
  }
  func.func @transform_6(%arg0: i32) -> (i32, i32) {
    %c0_i32 = arith.constant 0 : i32
    %c0_i32_0 = arith.constant 0 : i32
    return %arg0, %c0_i32 : i32, i32
  }
}

</mosaic_0001>

<bundles_post_ra>
// kernel: tpu_custom_call.1
= control target key start
LH: loop header
LB: loop body
LE: loop exit
PB: predicated region body
PF: predicated region fallthrough
CT: control target
= control target key end

     0   :  { %s862_s21 = smov 0   ;;  %s969_s0 = inlined_call_operand.vmem [shape: f32[512,18], index: 0, kind: input, shape index: {}]   ;;  %s970_s1 = inlined_call_operand.vmem [shape: f32[512,18], index: 1, kind: input, shape index: {}]   ;;  %s971_s2 = inlined_call_operand.vmem [shape: f32[18,8], index: 2, kind: input, shape index: {}]   ;;  %s972_s3 = inlined_call_operand.vmem [shape: f32[18,8], index: 3, kind: input, shape index: {}]   ;;  %s973_s4 = inlined_call_operand.vmem [shape: f32[1,8], index: 4, kind: input, shape index: {}]   ;;  %s974_s5 = inlined_call_operand.vmem [shape: f32[1,8], index: 5, kind: input, shape index: {}]   ;;  %s975_s6 = inlined_call_operand.vmem [shape: f32[512,8], index: 6, kind: output, shape index: {}]  }
   0x1 LB: > { %s712_s22 = sadd.s32 4294967295, %s825_s21   ;;  %p716_p0 = scmp.ge.s32.totalorder %s825_s21, 1  ;;  %s825_s21 = sphi %s862_s21, %s16_s21  }
   0x2   : > { %p224_p1 = scmp.lt.s32.totalorder %s825_s21, 9 }
   0x4   : > { %p225_p2 = pnand %p716_p0, %p224_p1 }
   0x5   : > { %v285_v0 = vld [vmem:[%s971_s2] sm:$0xff] (!%p225_p2)  ;;  %v286_v1 = vld [vmem:[%s971_s2 + $0x8] sm:$0xff] (!%p225_p2)  ;;  %s717_s29 = sshll.u32 (!%p225_p2), %s712_s22, 3  ;;  %v287_v6 = vld [vmem:[%s971_s2 + $0x10] sm:$0x3] (!%p225_p2)  ;;  %vm320_vm0 = vcmask (!%p225_p2), 1041408  }
   0x6   : > { %228 = sbr.rel (%p225_p2) target bundleno = 258 (0x102), region = 44  ;;  %v484_v2 = vld [vmem:[%s972_s3] sm:$0xff] (!%p225_p2)  ;;  %v803_v3 = vpack.c.bf16 (!%p225_p2), %v286_v1, %v285_v0  ;;  %v485_v4 = vld [vmem:[%s972_s3 + $0x8] sm:$0xff] (!%p225_p2)  ;;  %p260_p3 = scmp.lt.s32.totalorder (!%p225_p2), %s717_s29, 63  ;;  %v486_v7 = vld [vmem:[%s972_s3 + $0x10] sm:$0x3] (!%p225_p2) }
   0x7   : > { %v807_v5 = vpack.c.bf16 (!%p225_p2), %v485_v4, %v484_v2  ;;  %vm295_vm1 = vcmask (!%p225_p2), 146432   ;;  %v723_v24 = vld [vmem:[%s973_s4] ss:$0 sm:$0xff] (!%p225_p2)  ;;  %vm635_vm2 = vcmask (!%p225_p2), 64512  }
   0x8   : > { %804 = vmatprep.subr.bf16.mxu0 (!%p225_p2), %v803_v3  ;;  %v934_v26 = vld [vmem:[%s974_s5] ss:$0 sm:$0xff] (!%p225_p2) }
   0x9   : > { %806 = vmatpush3.bf16.msra.mxu0 (!%p225_p2), %v803_v3  ;;  %808 = vmatprep.subr.bf16.mxu1 (!%p225_p2), %v807_v5 }
   0xa   : > { %810 = vmatpush3.bf16.msra.mxu1 (!%p225_p2), %v807_v5  ;;  %771 = vmatprep.subr.msk.mxu0 (!%p225_p2), %vm320_vm0, %v287_v6 }
   0xb   : > { %789 = vmatprep.subr.msk.mxu1 (!%p225_p2), %vm320_vm0, %v486_v7 }
   0xd   : > { %s977_s29 = smov (!%p260_p3, %s717_s29), 63  ;;  %772 = vmatpush3.msk.msra.mxu0 %vm320_vm0, %v287_v6 }
   0xe   : > { %s889_s12 = sshll.u32 %s977_s29, 3  ;;  %790 = vmatpush3.msk.msra.mxu1 %vm320_vm0, %v486_v7 }
   0xf   : > { %s895_s15 = scalar_lea.vmem %s969_s0, %s889_s12  ;;  %s269_s18 = scalar_lea.vmem %s970_s1, %s889_s12 }
  0x10   : > { %v277_v8 = vld [vmem:[%s895_s15] sm:$0xff]  ;;  %v278_v9 = vld [vmem:[%s895_s15 + $0x8] sm:$0xff]  ;;  %v279_v10 = vld [vmem:[%s895_s15 + $0x10] sm:$0xff]  ;;  %s945_s26 = scalar_lea.vmem %s975_s6, %s889_s12 }
  0x11   : > { %773 = vmatprep.mubr.msk.f32.mxu0 %vm295_vm1, %v277_v8  ;;  %v476_v11 = vld [vmem:[%s269_s18] sm:$0xff]  ;;  %v477_v12 = vld [vmem:[%s269_s18 + $0x8] sm:$0xff]  ;;  %v478_v13 = vld [vmem:[%s269_s18 + $0x10] sm:$0xff] }
  0x12   : > { %774 = vmatmul.mubr.msk.f32.vlgmr.msra.gmra.mrb[0].mxu0 %vm295_vm1, %v278_v9  ;;  %791 = vmatprep.mubr.msk.f32.mxu1 %vm295_vm1, %v476_v11  ;;  %v280_v14 = vld [vmem:[%s895_s15 + $0x18] sm:$0xff]  ;;  %v281_v15 = vld [vmem:[%s895_s15 + $0x20] sm:$0xff]  ;;  %v282_v18 = vld [vmem:[%s895_s15 + $0x28] sm:$0xff] }
  0x13   : > { %776 = vmatprep.mubr.msk.f32.mxu0 %vm295_vm1, %v279_v10  ;;  %792 = vmatmul.mubr.msk.f32.vlgmr.msra.gmra.mrb[0].mxu1 %vm295_vm1, %v477_v12  ;;  %v479_v16 = vld [vmem:[%s269_s18 + $0x18] sm:$0xff]  ;;  %v480_v17 = vld [vmem:[%s269_s18 + $0x20] sm:$0xff]  ;;  %v283_v19 = vld [vmem:[%s895_s15 + $0x30] sm:$0xff] }
  0x14   : > { %794 = vmatprep.mubr.msk.f32.mxu1 %vm295_vm1, %v478_v13  ;;  %v481_v20 = vld [vmem:[%s269_s18 + $0x28] sm:$0xff]  ;;  %v482_v21 = vld [vmem:[%s269_s18 + $0x30] sm:$0xff]  ;;  %v284_v22 = vld [vmem:[%s895_s15 + $0x38] sm:$0xff] }
  0x15   : > { %v483_v23 = vld [vmem:[%s269_s18 + $0x38] sm:$0xff] }
  0x16   : > { %777 = vmatmul.mubr.msk.f32.gmra.mrb[2].mxu0 %vm295_vm1, %v280_v14 }
  0x17   : > { %779 = vmatprep.mubr.msk.f32.mxu0 %vm295_vm1, %v281_v15  ;;  %795 = vmatmul.mubr.msk.f32.gmra.mrb[2].mxu1 %vm295_vm1, %v479_v16 }
  0x18   : > { %797 = vmatprep.mubr.msk.f32.mxu1 %vm295_vm1, %v480_v17 }
  0x1a   : > { %780 = vmatmul.mubr.msk.f32.gmra.mrb[4].mxu0 %vm295_vm1, %v282_v18 }
  0x1b   : > { %782 = vmatprep.mubr.msk.f32.mxu0 %vm295_vm1, %v283_v19  ;;  %798 = vmatmul.mubr.msk.f32.gmra.mrb[4].mxu1 %vm295_vm1, %v481_v20 }
  0x1c   : > { %800 = vmatprep.mubr.msk.f32.mxu1 %vm295_vm1, %v482_v21 }
  0x1e   : > { %783 = vmatmul.mubr.msk.f32.gmra.mrb[6].mxu0 %vm295_vm1, %v284_v22 }
  0x1f   : > { %801 = vmatmul.mubr.msk.f32.gmra.mrb[6].mxu1 %vm295_vm1, %v483_v23 }
  0xe5   : > { %v775_v25 = vpop.f32.mrb[0].mxu0 }
  0xe6   : > { %v396_v27 = vadd.f32 %v775_v25, %v723_v24  ;;  %v390_v28 = vpop.f32.mrb[1].mxu0  ;;  %v793_v30 = vpop.f32.mrb[0].mxu1 }
  0xe7   : > { %v391_v29 = vadd.f32 %v723_v24, %v390_v28  ;;  %v580_v33 = vpop.f32.mrb[1].mxu1 }
  0xe8   : > { %v437_v31 = vsub.f32 %v934_v26, %v396_v27  ;;  %v620_v32 = vadd.f32 %v793_v30, %v396_v27 }
  0xe9   : > { %v436_v34 = vsub.f32 %v934_v26, %v391_v29  ;;  %v619_v35 = vadd.f32 %v580_v33, %v391_v29  ;;  %v778_v36 = vpop.f32.mrb[2].mxu0 }
  0xea   : > { %v445_v37 = vmax.f32 %v437_v31, 0.0  ;;  %v406_v38 = vadd.f32 %v778_v36, %v723_v24  ;;  %v400_v39 = vpop.f32.mrb[3].mxu0  ;;  %v796_v42 = vpop.f32.mrb[2].mxu1 }
  0xeb   : > { %v444_v40 = vmax.f32 %v436_v34, 0.0  ;;  %v401_v41 = vadd.f32 %v723_v24, %v400_v39  ;;  %v590_v46 = vpop.f32.mrb[3].mxu1 }
  0xec   : > { %v453_v43 = vmul.f32 0.5, %v445_v37  ;;  %v439_v44 = vsub.f32 %v934_v26, %v406_v38  ;;  %v622_v45 = vadd.f32 %v796_v42, %v406_v38 }
  0xed   : > { %v452_v47 = vmul.f32 0.5, %v444_v40  ;;  %v438_v48 = vsub.f32 %v934_v26, %v401_v41  ;;  %v621_v49 = vadd.f32 %v590_v46, %v401_v41  ;;  %v781_v50 = vpop.f32.mrb[4].mxu0 }
  0xee   : > { %v461_v51 = vsub.f32 1.0, %v453_v43  ;;  %v447_v52 = vmax.f32 %v439_v44, 0.0  ;;  %v416_v53 = vadd.f32 %v781_v50, %v723_v24  ;;  %v410_v54 = vpop.f32.mrb[5].mxu0  ;;  %v799_v58 = vpop.f32.mrb[4].mxu1 }
  0xef   : > { %v460_v55 = vsub.f32 1.0, %v452_v47  ;;  %v446_v56 = vmax.f32 %v438_v48, 0.0  ;;  %v411_v57 = vadd.f32 %v723_v24, %v410_v54  ;;  %v600_v63 = vpop.f32.mrb[5].mxu1 }
  0xf0   : > { %v469_v59 = vmax.f32 %v461_v51, 0.0  ;;  %v455_v60 = vmul.f32 0.5, %v447_v52  ;;  %v441_v61 = vsub.f32 %v934_v26, %v416_v53  ;;  %v624_v62 = vadd.f32 %v799_v58, %v416_v53 }
  0xf1   : > { %v468_v0 = vmax.f32 %v460_v55, 0.0  ;;  %v454_v1 = vmul.f32 0.5, %v446_v56  ;;  %v440_v2 = vsub.f32 %v934_v26, %v411_v57  ;;  %v623_v3 = vadd.f32 %v600_v63, %v411_v57  ;;  %v784_v4 = vpop.f32.mrb[6].mxu0 }
  0xf2   : > { %v628_v5 = vmul.f32 %v620_v32, %v469_v59  ;;  %v463_v6 = vsub.f32 1.0, %v455_v60  ;;  %v449_v7 = vmax.f32 %v441_v61, 0.0  ;;  %v426_v8 = vadd.f32 %v784_v4, %v723_v24  ;;  %v420_v9 = vpop.f32.mrb[7].mxu0  ;;  %v802_v14 = vpop.f32.mrb[6].mxu1 }
  0xf3   : > { %v627_v10 = vmul.f32 %v619_v35, %v468_v0  ;;  %v462_v11 = vsub.f32 1.0, %v454_v1  ;;  %v448_v12 = vmax.f32 %v440_v2, 0.0  ;;  %v421_v13 = vadd.f32 %v723_v24, %v420_v9  ;;  %v610_v19 = vpop.f32.mrb[7].mxu1 }
  0xf4   : > { %637 = vst.msk [vmem:[%s945_s26 + $0x8] sm:$0xff] %vm635_vm2, %v628_v5  ;;  %v471_v15 = vmax.f32 %v463_v6, 0.0  ;;  %v457_v16 = vmul.f32 0.5, %v449_v7  ;;  %v443_v17 = vsub.f32 %v934_v26, %v426_v8  ;;  %v626_v18 = vadd.f32 %v802_v14, %v426_v8 }
  0xf5   : > { %636 = vst.msk [vmem:[%s945_s26] sm:$0xff] %vm635_vm2, %v627_v10  ;;  %v470_v20 = vmax.f32 %v462_v11, 0.0  ;;  %v456_v21 = vmul.f32 0.5, %v448_v12  ;;  %v442_v22 = vsub.f32 %v934_v26, %v421_v13  ;;  %v625_v23 = vadd.f32 %v610_v19, %v421_v13 }
  0xf6   : > { %v630_v25 = vmul.f32 %v622_v45, %v471_v15  ;;  %v465_v24 = vsub.f32 1.0, %v457_v16  ;;  %v451_v27 = vmax.f32 %v443_v17, 0.0 }
  0xf7   : > { %v629_v28 = vmul.f32 %v621_v49, %v470_v20  ;;  %v464_v29 = vsub.f32 1.0, %v456_v21  ;;  %v450_v30 = vmax.f32 %v442_v22, 0.0 }
  0xf8   : > { %639 = vst.msk [vmem:[%s945_s26 + $0x18] sm:$0xff] %vm635_vm2, %v630_v25  ;;  %v473_v31 = vmax.f32 %v465_v24, 0.0  ;;  %v459_v32 = vmul.f32 0.5, %v451_v27 }
  0xf9   : > { %638 = vst.msk [vmem:[%s945_s26 + $0x10] sm:$0xff] %vm635_vm2, %v629_v28  ;;  %v472_v33 = vmax.f32 %v464_v29, 0.0  ;;  %v458_v34 = vmul.f32 0.5, %v450_v30 }
  0xfa   : > { %v632_v26 = vmul.f32 %v624_v62, %v473_v31  ;;  %v467_v35 = vsub.f32 1.0, %v459_v32 }
  0xfb   : > { %v631_v36 = vmul.f32 %v623_v3, %v472_v33  ;;  %v466_v37 = vsub.f32 1.0, %v458_v34 }
  0xfc   : > { %641 = vst.msk [vmem:[%s945_s26 + $0x28] sm:$0xff] %vm635_vm2, %v632_v26  ;;  %v475_v38 = vmax.f32 %v467_v35, 0.0 }
  0xfd   : > { %640 = vst.msk [vmem:[%s945_s26 + $0x20] sm:$0xff] %vm635_vm2, %v631_v36  ;;  %v474_v39 = vmax.f32 %v466_v37, 0.0 }
  0xfe   : > { %v634_v40 = vmul.f32 %v626_v18, %v475_v38 }
  0xff   : > { %v633_v41 = vmul.f32 %v625_v23, %v474_v39 }
 0x100   : > { %643 = vst.msk [vmem:[%s945_s26 + $0x38] sm:$0xff] %vm635_vm2, %v634_v40 }
 0x101   : > { %642 = vst.msk [vmem:[%s945_s26 + $0x30] sm:$0xff] %vm635_vm2, %v633_v41 }
 0x102 PF: > { %s16_s21 = sadd.s32 1, %s825_s21  }
 0x103   : > { %p13_p4 = scmp.ge.s32.totalorder %s16_s21, 10  }
 0x105   :  { %15 = sbr.rel (!%p13_p4) target bundleno = 1 (0x1), region = 77 }

</bundles_post_ra>
